<compile_context>
chip_gen: v6e
topology: v6e:2x2x1
jax: 0.10.0
libtpu: 0.0.40
codegen_flags: <defaults>
</compile_context>

<pallas_src>
import functools

import jax
import jax.numpy as jnp
from jax.experimental import pallas as pl
from jax.experimental.pallas import tpu as pltpu

_NEG_BIG = -1e30  # finite "-inf": (-1e30) - (-1e30) == 0, never NaN


def _round_up(x, m):
    return ((x + m - 1) // m) * m


def _detect_tpu():
    """Returns (usable VMEM budget in bytes, chip has 2 TensorCores) with safe fallbacks."""
    vmem_cap = 64 * 1024 * 1024      # conservative default (v7x-sized)
    two_cores = False
    try:
        info = pltpu.get_tpu_info()
        vmem_cap = int(getattr(info, "vmem_capacity_bytes", vmem_cap))
        # v7x has 2 TensorCores per chip; v5e/v6e have 1.
        two_cores = "7" in str(getattr(info, "chip_version", ""))
    except Exception:
        pass
    return min(int(vmem_cap * 0.70), 96 * 1024 * 1024), two_cores


def _supcon_kernel(temp_ref, needs_ref, q_ref, k_ref, rid_ref, cid_ref, selfc_ref,
                   out_ref, qs_ref, m_ref, l_ref, s_ref, c_ref, *,
                   n_valid, anchor_n, base_temperature):
    i = pl.program_id(0)                  # anchor (row) tile  -- "parallel"
    j = pl.program_id(1)                  # contrast (col) tile -- reduction, last
    last_j = pl.num_programs(1) - 1
    tq, tk = qs_ref.shape[0], k_ref.shape[0]

    # ---- per-row-tile init: hoist the 1/T scale + MXU cast of the resident anchor.
    @pl.when(j == 0)
    def _init():
        inv_t = 1.0 / temp_ref[0]
        qs_ref[...] = (q_ref[...].astype(jnp.float32) * inv_t).astype(qs_ref.dtype)
        m_ref[...] = jnp.full_like(m_ref, _NEG_BIG)
        l_ref[...] = jnp.zeros_like(l_ref)
        s_ref[...] = jnp.zeros_like(s_ref)
        c_ref[...] = jnp.zeros_like(c_ref)

    # anchor . contrast^T on the MXU: contract the feature dim of BOTH operands
    # (no transposed copy of the contrast tile), accumulate in f32.
    logits = jax.lax.dot_general(
        qs_ref[...], k_ref[...],
        dimension_numbers=(((1,), (1,)), ((), ())),
        preferred_element_type=jnp.float32)                       # [tq, tk]

    def accumulate(masked, pos):
        # Online softmax for the denominator (logsumexp over valid columns) plus
        # linear numerator stats (sum of positive logits, positive count).
        m_prev = m_ref[...]
        m_new = jnp.maximum(m_prev, jnp.max(masked, axis=1, keepdims=True))
        alpha = jnp.exp(m_prev - m_new)
        p = jnp.exp(masked - m_new)        # -1e30 columns underflow to exactly 0
        l_ref[...] = alpha * l_ref[...] + jnp.sum(p, axis=1, keepdims=True)
        m_ref[...] = m_new
        s_ref[...] += jnp.sum(jnp.where(pos, masked, 0.0), axis=1, keepdims=True)
        c_ref[...] += jnp.sum(pos.astype(jnp.float32), axis=1, keepdims=True)

    # Host-precomputed flag: does this (i, j) tile contain a self-contrast column
    # or padded columns?  Most tiles do not, and skip the mask rebuild entirely.
    flag = needs_ref[i * pl.num_programs(1) + j]

    @pl.when(flag != 0)
    def _masked_tile():
        col = jax.lax.broadcasted_iota(jnp.int32, (tq, tk), 1)
        valid = jnp.logical_and(col != (selfc_ref[...] - j * tk),   # no self-contrast
                                col < (n_valid - j * tk))           # no padded cols
        masked = jnp.where(valid, logits, _NEG_BIG)
        pos = jnp.logical_and(rid_ref[...] == cid_ref[...], valid)
        accumulate(masked, pos)

    @pl.when(flag == 0)
    def _plain_tile():
        accumulate(logits, rid_ref[...] == cid_ref[...])

    @pl.when(j == last_j)
    def _finalize():
        row = i * tq + jax.lax.broadcasted_iota(jnp.int32, (tq, 1), 0)
        row_ok = row < anchor_n                    # drop padded anchor rows
        cnt = c_ref[...]
        lse = m_ref[...] + jnp.log(l_ref[...])
        # mean_log_prob_pos_i = sum_pos(logit_i)/count_i - logsumexp_i
        # TODO(synk): rows with zero positives contribute 0 here (PyTorch yields NaN).
        mean_lp = jnp.where(jnp.logical_and(row_ok, cnt > 0.0),
                            s_ref[...] / cnt - lse, 0.0)
        partial = jnp.sum(mean_lp) * (-1.0 / (base_temperature * anchor_n))
        out_ref[...] = jnp.full(out_ref.shape, partial, dtype=out_ref.dtype)


def supcon_loss(features, labels=None, mask=None, *, temperature,
                base_temperature=0.07, contrast_mode="all",
                mxu_dtype=jnp.bfloat16, block_q=None, block_k=None):
    """Pallas TPU implementation of SupConLoss.forward (modes 'all' and 'one')."""
    if features.ndim < 3:
        raise ValueError("`features` needs to be [bsz, n_views, ...]")
    bsz, n_views = features.shape[0], features.shape[1]
    feats = features.reshape(bsz, n_views, -1).astype(jnp.float32)
    d = feats.shape[-1]
    n = bsz * n_views

    if labels is not None and mask is not None:
        raise ValueError("Cannot define both `labels` and `mask`")
    if mask is not None:
        # TODO(synk): arbitrary (possibly asymmetric) [bsz, bsz] masks would need a tiled
        # int8 mask input; only the SimCLR / label-equality paths are kernelized.
        raise NotImplementedError("explicit `mask` is not supported by the Pallas kernel")
    if labels is None:
        sample_ids = jnp.arange(bsz, dtype=jnp.int32)            # SimCLR: eye(bsz)
    else:
        sample_ids = jnp.asarray(labels, jnp.int32).reshape(-1)
        if sample_ids.shape[0] != bsz:
            raise ValueError("Num of labels does not match num of features")

    # Sample-major flattening (free reshape, no host transpose).  The loss is
    # invariant to the contrast-row ordering, so this matches the torch math.
    contrast = feats.reshape(n, d)
    contrast_ids = jnp.repeat(sample_ids, n_views)

    if contrast_mode == "all":
        anchor, anchor_ids = contrast, contrast_ids
        self_col = jnp.arange(n, dtype=jnp.int32)
        anchor_n = n
    elif contrast_mode == "one":
        anchor = feats[:, 0, :]
        anchor_ids = sample_ids
        self_col = jnp.arange(bsz, dtype=jnp.int32) * n_views
        anchor_n = bsz
    else:
        raise ValueError(f"Unknown mode: {contrast_mode}")

    # ---- generation-aware tile selection ------------------------------------
    vmem_budget, two_cores = _detect_tpu()
    dp = _round_up(d, 128)
    if block_q is None:
        block_q = 1024 if dp <= 512 else 512
    if block_k is None:
        block_k = 2048 if dp <= 256 else 512
    assert block_q % 8 == 0 and block_k % 128 == 0

    a8 = _round_up(anchor_n, 8)
    n8 = _round_up(n, 8)
    tq = a8 if a8 <= block_q else block_q
    tk = n8 if n8 <= block_k else block_k            # single col tile for small N
    # v7x (2 TensorCores): ensure the "parallel" anchor axis has >= 2 tiles.
    if two_cores and anchor_n > 16 and pl.cdiv(anchor_n, tq) < 2:
        tq = _round_up(pl.cdiv(anchor_n, 2), 8)

    mxu_bytes = jnp.dtype(mxu_dtype).itemsize

    def est_vmem(tq_, tk_):
        return (2 * (tq_ * dp * 4 + tk_ * dp * mxu_bytes)   # double-buffered feature tiles
                + tq_ * dp * mxu_bytes + 4 * tq_ * 4        # scaled-anchor scratch + stats
                + 6 * tq_ * tk_ * 4                         # elementwise temporaries
                + 4 * 128 * 4)

    while est_vmem(tq, tk) > vmem_budget and tk > 256:
        tk = max(256, _round_up(tk // 2, 128))
    while est_vmem(tq, tk) > vmem_budget and tq > 256:
        tq = max(256, _round_up(tq // 2, 8))

    g_rows = pl.cdiv(anchor_n, tq)
    g_cols = pl.cdiv(n, tk)
    rows_q = g_rows * tq
    cols_c = g_cols * tk

    def pad2d(x, r, c, dtype):
        x = x.astype(dtype)
        if x.shape == (r, c):
            return x
        return jnp.zeros((r, c), dtype).at[:x.shape[0], :x.shape[1]].set(x)

    def pad1d(x, size, fill):
        if x.shape[0] == size:
            return x
        return jnp.full((size,), fill, x.dtype).at[:x.shape[0]].set(x)

    anchor_p = pad2d(anchor, rows_q, dp, jnp.float32)          # scaled+cast in-kernel
    contrast_p = pad2d(contrast, cols_c, dp, mxu_dtype)        # pre-cast: halves re-streamed HBM
    rid = pad1d(anchor_ids, rows_q, -1).reshape(rows_q, 1)
    cid = pad1d(contrast_ids, cols_c, -2).reshape(1, cols_c)
    selfc_1d = pad1d(self_col, rows_q, -1)
    selfc = selfc_1d.reshape(rows_q, 1)
    temp = jnp.asarray(temperature, jnp.float32).reshape(1)

    # Which (row-tile, col-tile) cells need masking (self-contrast column in range,
    # or padded contrast columns)?  Exact per-row test, computed once on the host.
    self_tile = selfc_1d.reshape(g_rows, tq) // tk             # padded rows -> -1, matches no j
    needs = (self_tile[:, :, None] ==
             jnp.arange(g_cols, dtype=jnp.int32)[None, None, :]).any(axis=1)
    if n % tk != 0:
        needs = needs.at[:, g_cols - 1].set(True)
    needs_flags = needs.astype(jnp.int32).reshape(-1)          # (g_rows * g_cols,)

    kernel = functools.partial(
        _supcon_kernel, n_valid=n, anchor_n=anchor_n,
        base_temperature=float(base_temperature))

    partials = pl.pallas_call(
        kernel,
        out_shape=jax.ShapeDtypeStruct((g_rows, 1, 128), jnp.float32),
        grid=(g_rows, g_cols),
        in_specs=[
            pl.BlockSpec(memory_space=pltpu.MemorySpace.SMEM),   # temperature (1,)
            pl.BlockSpec(memory_space=pltpu.MemorySpace.SMEM),   # per-tile mask flags
            pl.BlockSpec((tq, dp), lambda i, j: (i, 0)),         # anchor tile (f32, resident)
            pl.BlockSpec((tk, dp), lambda i, j: (j, 0)),         # contrast tile (streamed)
            pl.BlockSpec((tq, 1), lambda i, j: (i, 0)),          # anchor ids
            pl.BlockSpec((1, tk), lambda i, j: (0, j)),          # contrast ids
            pl.BlockSpec((tq, 1), lambda i, j: (i, 0)),          # self-column idx
        ],
        out_specs=pl.BlockSpec((1, 1, 128), lambda i, j: (i, 0, 0)),
        scratch_shapes=[
            pltpu.VMEM((tq, dp), mxu_dtype),        # scaled + cast anchor (filled at j==0)
            pltpu.VMEM((tq, 1), jnp.float32),       # running max m
            pltpu.VMEM((tq, 1), jnp.float32),       # running exp-sum l
            pltpu.VMEM((tq, 1), jnp.float32),       # sum of positive logits
            pltpu.VMEM((tq, 1), jnp.float32),       # positive count
        ],
        compiler_params=pltpu.CompilerParams(
            dimension_semantics=("parallel", "arbitrary"),
            vmem_limit_bytes=int(vmem_budget)),
    )(temp, needs_flags, anchor_p, contrast_p, rid, cid, selfc)
    return jnp.sum(partials[:, 0, 0])


def _supcon_ref(features, labels=None, *, temperature, base_temperature=0.07,
                contrast_mode="all"):
    """Pure-JAX mirror of the PyTorch SupConLoss.forward (view-major, un-tiled)."""
    bsz, n_views, d = features.shape
    contrast = jnp.transpose(features, (1, 0, 2)).reshape(n_views * bsz, d)
    if labels is None:
        base_mask = jnp.eye(bsz, dtype=jnp.float32)
    else:
        lab = jnp.asarray(labels).reshape(-1, 1)
        base_mask = (lab == lab.T).astype(jnp.float32)
    if contrast_mode == "all":
        anchor, anchor_count = contrast, n_views
    else:
        anchor, anchor_count = features[:, 0], 1
    n_anchor = anchor_count * bsz
    n = n_views * bsz
    logits = anchor @ contrast.T / temperature
    logits = logits - jax.lax.stop_gradient(jnp.max(logits, axis=1, keepdims=True))
    mask = jnp.tile(base_mask, (anchor_count, n_views))
    logits_mask = jnp.ones((n_anchor, n), jnp.float32).at[
        jnp.arange(n_anchor), jnp.arange(n_anchor)].set(0.0)
    mask = mask * logits_mask
    exp_logits = jnp.exp(logits) * logits_mask
    log_prob = logits - jnp.log(exp_logits.sum(1, keepdims=True))
    mean_log_prob_pos = (mask * log_prob).sum(1) / mask.sum(1)
    return jnp.mean(-(1.0 / base_temperature) * mean_log_prob_pos)


if __name__ == "__main__":
    TEMPERATURE = 0.07        # matches nn.Parameter(FloatTensor([0.07]))
    BASE_TEMPERATURE = 0.07

    key = jax.random.PRNGKey(0)
    k1, k2 = jax.random.split(key)

    # Small config consistent with the module's typical use.
    bsz, n_views, hidden = 8, 2, 32
    feats = jax.random.normal(k1, (bsz, n_views, hidden), jnp.float32)
    feats = feats / jnp.linalg.norm(feats, axis=-1, keepdims=True)
    labels = jnp.array([0, 1, 2, 3, 0, 1, 2, 3], jnp.int32)

    # 1) SimCLR path (labels=None), contrast_mode='all', f32 MXU operands.
    got = jax.block_until_ready(
        supcon_loss(feats, temperature=TEMPERATURE, base_temperature=BASE_TEMPERATURE,
                    mxu_dtype=jnp.float32))
    ref = _supcon_ref(feats, temperature=TEMPERATURE, base_temperature=BASE_TEMPERATURE)
    assert jnp.allclose(got, ref, rtol=1e-5, atol=1e-5), ("simclr", got, ref)

    # 2) Supervised path (labels), contrast_mode='all'.
    got = jax.block_until_ready(
        supcon_loss(feats, labels=labels, temperature=TEMPERATURE,
                    base_temperature=BASE_TEMPERATURE, mxu_dtype=jnp.float32))
    ref = _supcon_ref(feats, labels, temperature=TEMPERATURE,
                      base_temperature=BASE_TEMPERATURE)
    assert jnp.allclose(got, ref, rtol=1e-5, atol=1e-5), ("labels", got, ref)

    # 3) contrast_mode='one'.
    got = jax.block_until_ready(
        supcon_loss(feats, labels=labels, temperature=TEMPERATURE,
                    base_temperature=BASE_TEMPERATURE, contrast_mode="one",
                    mxu_dtype=jnp.float32))
    ref = _supcon_ref(feats, labels, temperature=TEMPERATURE,
                      base_temperature=BASE_TEMPERATURE, contrast_mode="one")
    assert jnp.allclose(got, ref, rtol=1e-5, atol=1e-5), ("one", got, ref)

    # 4) Multi-tile grid: exercises the fast/slow tile split, online-softmax
    #    accumulation across contrast tiles and >= 2 parallel anchor-row tiles.
    bsz2, nv2, hid2 = 128, 2, 64
    feats2 = jax.random.normal(k2, (bsz2, nv2, hid2), jnp.float32)
    feats2 = feats2 / jnp.linalg.norm(feats2, axis=-1, keepdims=True)
    ref2 = _supcon_ref(feats2, temperature=TEMPERATURE, base_temperature=BASE_TEMPERATURE)
    got_f32 = jax.block_until_ready(
        supcon_loss(feats2, temperature=TEMPERATURE, base_temperature=BASE_TEMPERATURE,
                    block_q=128, block_k=128, mxu_dtype=jnp.float32))
    assert jnp.allclose(got_f32, ref2, rtol=1e-4, atol=1e-4), ("tiled-f32", got_f32, ref2)

    # 4b) Labels spread across tiles so positives hit the unmasked fast path too.
    labels2 = jnp.arange(bsz2, dtype=jnp.int32) % 8
    ref3 = _supcon_ref(feats2, labels2, temperature=TEMPERATURE,
                       base_temperature=BASE_TEMPERATURE)
    got3 = jax.block_until_ready(
        supcon_loss(feats2, labels2, temperature=TEMPERATURE,
                    base_temperature=BASE_TEMPERATURE,
                    block_q=128, block_k=128, mxu_dtype=jnp.float32))
    assert jnp.allclose(got3, ref3, rtol=1e-4, atol=1e-4), ("tiled-labels", got3, ref3)

    # 4c) Default bf16 MXU operands (f32 accumulation / stats), looser tolerance.
    got_bf16 = jax.block_until_ready(
        supcon_loss(feats2, temperature=TEMPERATURE, base_temperature=BASE_TEMPERATURE,
                    block_q=128, block_k=128))
    assert jnp.allclose(got_bf16, ref2, rtol=5e-2, atol=5e-2), ("tiled-bf16", got_bf16, ref2)

    print("KERNEL_OK")
</pallas_src>

<mosaic_0001>
module attributes {stable_mosaic.version = 11 : i64} {
  func.func @_supcon_kernel(%arg0: i32, %arg1: i32, %arg2: memref<1xf32, #tpu.memory_space<smem>>, %arg3: memref<1xi32, #tpu.memory_space<smem>>, %arg4: memref<16x128xf32, #tpu.memory_space<vmem>>, %arg5: memref<16x128xf32, #tpu.memory_space<vmem>>, %arg6: memref<16x1xi32, #tpu.memory_space<vmem>>, %arg7: memref<1x16xi32, #tpu.memory_space<vmem>>, %arg8: memref<16x1xi32, #tpu.memory_space<vmem>>, %arg9: memref<1x1x128xf32, #tpu.memory_space<vmem>>, %arg10: memref<16x128xf32, #tpu.memory_space<vmem>>, %arg11: memref<16x1xf32, #tpu.memory_space<vmem>>, %arg12: memref<16x1xf32, #tpu.memory_space<vmem>>, %arg13: memref<16x1xf32, #tpu.memory_space<vmem>>, %arg14: memref<16x1xf32, #tpu.memory_space<vmem>>) attributes {dimension_semantics = [#tpu.dimension_semantics<parallel>, #tpu.dimension_semantics<arbitrary>], iteration_bounds = array<i64: 1, 1>, scalar_prefetch = 0 : i64, scratch_operands = 5 : i64, tpu.core_type = #tpu.core_type<tc>, window_params = [{transform_indices = @transform_0, window_bounds = array<i64: 1>}, {transform_indices = @transform_1, window_bounds = array<i64: 1>}, {transform_indices = @transform_2, window_bounds = array<i64: 16, 128>}, {transform_indices = @transform_3, window_bounds = array<i64: 16, 128>}, {transform_indices = @transform_4, window_bounds = array<i64: 16, 1>}, {transform_indices = @transform_5, window_bounds = array<i64: 1, 16>}, {transform_indices = @transform_6, window_bounds = array<i64: 16, 1>}, {transform_indices = @transform_7, window_bounds = array<i64: 1, 1, 128>}]} {
    %c0_i32 = arith.constant 0 : i32
    %0 = arith.cmpi eq, %arg1, %c0_i32 : i32
    %1 = arith.extui %0 : i1 to i32
    %c0_i32_0 = arith.constant 0 : i32
    %2 = arith.cmpi ne, %1, %c0_i32_0 : i32
    scf.if %2 {
      %c0_10 = arith.constant 0 : index
      %19 = memref.load %arg2[%c0_10] : memref<1xf32, #tpu.memory_space<smem>>
      %cst_11 = arith.constant 1.000000e+00 : f32
      %20 = arith.divf %cst_11, %19 : f32
      %c0_12 = arith.constant 0 : index
      %c0_13 = arith.constant 0 : index
      %21 = vector.load %arg4[%c0_12, %c0_13] : memref<16x128xf32, #tpu.memory_space<vmem>>, vector<16x128xf32>
      %22 = vector.broadcast %20 : f32 to vector<16x128xf32>
      %23 = arith.mulf %21, %22 : vector<16x128xf32>
      %c0_14 = arith.constant 0 : index
      %c0_15 = arith.constant 0 : index
      %24 = vector.load %arg10[%c0_14, %c0_15] : memref<16x128xf32, #tpu.memory_space<vmem>>, vector<16x128xf32>
      tpu.vector_store %arg10[%c0_14, %c0_15], %23 {strides = array<i32>} : memref<16x128xf32, #tpu.memory_space<vmem>>, vector<16x128xf32>,
      %cst_16 = arith.constant -1.000000e+30 : f32
      %25 = vector.broadcast %cst_16 : f32 to vector<16x1xf32>
      %c0_17 = arith.constant 0 : index
      %c0_18 = arith.constant 0 : index
      %26 = vector.load %arg11[%c0_17, %c0_18] : memref<16x1xf32, #tpu.memory_space<vmem>>, vector<16x1xf32>
      tpu.vector_store %arg11[%c0_17, %c0_18], %25 {strides = array<i32>} : memref<16x1xf32, #tpu.memory_space<vmem>>, vector<16x1xf32>,
      %cst_19 = arith.constant 0.000000e+00 : f32
      %27 = vector.broadcast %cst_19 : f32 to vector<16x1xf32>
      %c0_20 = arith.constant 0 : index
      %c0_21 = arith.constant 0 : index
      %28 = vector.load %arg12[%c0_20, %c0_21] : memref<16x1xf32, #tpu.memory_space<vmem>>, vector<16x1xf32>
      tpu.vector_store %arg12[%c0_20, %c0_21], %27 {strides = array<i32>} : memref<16x1xf32, #tpu.memory_space<vmem>>, vector<16x1xf32>,
      %cst_22 = arith.constant 0.000000e+00 : f32
      %29 = vector.broadcast %cst_22 : f32 to vector<16x1xf32>
      %c0_23 = arith.constant 0 : index
      %c0_24 = arith.constant 0 : index
      %30 = vector.load %arg13[%c0_23, %c0_24] : memref<16x1xf32, #tpu.memory_space<vmem>>, vector<16x1xf32>
      tpu.vector_store %arg13[%c0_23, %c0_24], %29 {strides = array<i32>} : memref<16x1xf32, #tpu.memory_space<vmem>>, vector<16x1xf32>,
      %cst_25 = arith.constant 0.000000e+00 : f32
      %31 = vector.broadcast %cst_25 : f32 to vector<16x1xf32>
      %c0_26 = arith.constant 0 : index
      %c0_27 = arith.constant 0 : index
      %32 = vector.load %arg14[%c0_26, %c0_27] : memref<16x1xf32, #tpu.memory_space<vmem>>, vector<16x1xf32>
      tpu.vector_store %arg14[%c0_26, %c0_27], %31 {strides = array<i32>} : memref<16x1xf32, #tpu.memory_space<vmem>>, vector<16x1xf32>,
    } else {
    }
    %c0 = arith.constant 0 : index
    %c0_1 = arith.constant 0 : index
    %3 = vector.load %arg10[%c0, %c0_1] : memref<16x128xf32, #tpu.memory_space<vmem>>, vector<16x128xf32>
    %c0_2 = arith.constant 0 : index
    %c0_3 = arith.constant 0 : index
    %4 = vector.load %arg5[%c0_2, %c0_3] : memref<16x128xf32, #tpu.memory_space<vmem>>, vector<16x128xf32>
    %cst = arith.constant dense<0.000000e+00> : vector<16x16xf32>
    %5 = tpu.matmul %3, %4, %cst {dimension_numbers = #tpu.dot_dimension_numbers<[1], [1], [0], [0], [0, 0, 1, 0], [], []>} : vector<16x128xf32>, vector<16x128xf32>, vector<16x16xf32> -> vector<16x16xf32>
    %c1_i32 = arith.constant 1 : i32
    %6 = arith.muli %arg0, %c1_i32 : i32
    %7 = arith.addi %6, %arg1 : i32
    %8 = arith.index_cast %7 : i32 to index
    %9 = memref.load %arg3[%8] : memref<1xi32, #tpu.memory_space<smem>>
    %c0_i32_4 = arith.constant 0 : i32
    %10 = arith.cmpi ne, %9, %c0_i32_4 : i32
    %11 = arith.extui %10 : i1 to i32
    %c0_i32_5 = arith.constant 0 : i32
    %12 = arith.cmpi ne, %11, %c0_i32_5 : i32
    scf.if %12 {
      %19 = tpu.iota {dimensions = array<i32: 1>} : vector<16x16xi32>
      %c0_10 = arith.constant 0 : index
      %c0_11 = arith.constant 0 : index
      %20 = vector.load %arg8[%c0_10, %c0_11] : memref<16x1xi32, #tpu.memory_space<vmem>>, vector<16x1xi32>
      %c16_i32 = arith.constant 16 : i32
      %21 = arith.muli %arg1, %c16_i32 : i32
      %22 = vector.broadcast %21 : i32 to vector<16x1xi32>
      %23 = arith.subi %20, %22 : vector<16x1xi32>
      %24 = vector.broadcast %23 : vector<16x1xi32> to vector<16x16xi32>
      %25 = arith.cmpi ne, %19, %24 : vector<16x16xi32>
      %c16_i32_12 = arith.constant 16 : i32
      %26 = arith.muli %arg1, %c16_i32_12 : i32
      %c16_i32_13 = arith.constant 16 : i32
      %27 = arith.subi %c16_i32_13, %26 : i32
      %28 = vector.broadcast %27 : i32 to vector<16x16xi32>
      %29 = arith.cmpi slt, %19, %28 : vector<16x16xi32>
      %30 = arith.andi %25, %29 : vector<16x16xi1>
      %cst_14 = arith.constant -1.000000e+30 : f32
      %31 = vector.broadcast %cst_14 : f32 to vector<16x16xf32>
      %32 = arith.select %30, %5, %31 : vector<16x16xi1>, vector<16x16xf32>
      %c0_15 = arith.constant 0 : index
      %c0_16 = arith.constant 0 : index
      %33 = vector.load %arg6[%c0_15, %c0_16] : memref<16x1xi32, #tpu.memory_space<vmem>>, vector<16x1xi32>
      %c0_17 = arith.constant 0 : index
      %c0_18 = arith.constant 0 : index
      %34 = vector.load %arg7[%c0_17, %c0_18] : memref<1x16xi32, #tpu.memory_space<vmem>>, vector<1x16xi32>
      %35 = vector.broadcast %33 : vector<16x1xi32> to vector<16x16xi32>
      %36 = vector.broadcast %34 : vector<1x16xi32> to vector<16x16xi32>
      %37 = arith.cmpi eq, %35, %36 : vector<16x16xi32>
      %38 = arith.andi %37, %30 : vector<16x16xi1>
      %c0_19 = arith.constant 0 : index
      %c0_20 = arith.constant 0 : index
      %39 = vector.load %arg11[%c0_19, %c0_20] : memref<16x1xf32, #tpu.memory_space<vmem>>, vector<16x1xf32>
      %cst_21 = arith.constant dense<0xFF800000> : vector<16xf32>
      %40 = vector.multi_reduction <maximumf>, %32, %cst_21 [1] : vector<16x16xf32> to vector<16xf32>
      %41 = vector.shape_cast %40 : vector<16xf32> to vector<16x1xf32>
      %42 = arith.maximumf %39, %41 : vector<16x1xf32>
      %43 = arith.subf %39, %42 : vector<16x1xf32>
      %44 = math.exp %43 : vector<16x1xf32>
      %45 = vector.broadcast %42 : vector<16x1xf32> to vector<16x16xf32>
      %46 = arith.subf %32, %45 : vector<16x16xf32>
      %47 = math.exp %46 : vector<16x16xf32>
      %c0_22 = arith.constant 0 : index
      %c0_23 = arith.constant 0 : index
      %48 = vector.load %arg12[%c0_22, %c0_23] : memref<16x1xf32, #tpu.memory_space<vmem>>, vector<16x1xf32>
      %49 = arith.mulf %44, %48 : vector<16x1xf32>
      %cst_24 = arith.constant dense<0.000000e+00> : vector<16xf32>
      %50 = vector.multi_reduction <add>, %47, %cst_24 [1] : vector<16x16xf32> to vector<16xf32>
      %51 = vector.shape_cast %50 : vector<16xf32> to vector<16x1xf32>
      %52 = arith.addf %49, %51 : vector<16x1xf32>
      %c0_25 = arith.constant 0 : index
      %c0_26 = arith.constant 0 : index
      %53 = vector.load %arg12[%c0_25, %c0_26] : memref<16x1xf32, #tpu.memory_space<vmem>>, vector<16x1xf32>
      tpu.vector_store %arg12[%c0_25, %c0_26], %52 {strides = array<i32>} : memref<16x1xf32, #tpu.memory_space<vmem>>, vector<16x1xf32>,
      %c0_27 = arith.constant 0 : index
      %c0_28 = arith.constant 0 : index
      %54 = vector.load %arg11[%c0_27, %c0_28] : memref<16x1xf32, #tpu.memory_space<vmem>>, vector<16x1xf32>
      tpu.vector_store %arg11[%c0_27, %c0_28], %42 {strides = array<i32>} : memref<16x1xf32, #tpu.memory_space<vmem>>, vector<16x1xf32>,
      %c0_29 = arith.constant 0 : index
      %c0_30 = arith.constant 0 : index
      %55 = vector.load %arg13[%c0_29, %c0_30] : memref<16x1xf32, #tpu.memory_space<vmem>>, vector<16x1xf32>
      %cst_31 = arith.constant 0.000000e+00 : f32
      %56 = vector.broadcast %cst_31 : f32 to vector<16x16xf32>
      %57 = arith.select %38, %32, %56 : vector<16x16xi1>, vector<16x16xf32>
      %cst_32 = arith.constant dense<0.000000e+00> : vector<16xf32>
      %58 = vector.multi_reduction <add>, %57, %cst_32 [1] : vector<16x16xf32> to vector<16xf32>
      %59 = vector.shape_cast %58 : vector<16xf32> to vector<16x1xf32>
      %60 = arith.addf %55, %59 : vector<16x1xf32>
      %c0_33 = arith.constant 0 : index
      %c0_34 = arith.constant 0 : index
      %61 = vector.load %arg13[%c0_33, %c0_34] : memref<16x1xf32, #tpu.memory_space<vmem>>, vector<16x1xf32>
      tpu.vector_store %arg13[%c0_33, %c0_34], %60 {strides = array<i32>} : memref<16x1xf32, #tpu.memory_space<vmem>>, vector<16x1xf32>,
      %c0_35 = arith.constant 0 : index
      %c0_36 = arith.constant 0 : index
      %62 = vector.load %arg14[%c0_35, %c0_36] : memref<16x1xf32, #tpu.memory_space<vmem>>, vector<16x1xf32>
      %63 = arith.extui %38 : vector<16x16xi1> to vector<16x16xi32>
      %64 = arith.sitofp %63 : vector<16x16xi32> to vector<16x16xf32>
      %cst_37 = arith.constant dense<0.000000e+00> : vector<16xf32>
      %65 = vector.multi_reduction <add>, %64, %cst_37 [1] : vector<16x16xf32> to vector<16xf32>
      %66 = vector.shape_cast %65 : vector<16xf32> to vector<16x1xf32>
      %67 = arith.addf %62, %66 : vector<16x1xf32>
      %c0_38 = arith.constant 0 : index
      %c0_39 = arith.constant 0 : index
      %68 = vector.load %arg14[%c0_38, %c0_39] : memref<16x1xf32, #tpu.memory_space<vmem>>, vector<16x1xf32>
      tpu.vector_store %arg14[%c0_38, %c0_39], %67 {strides = array<i32>} : memref<16x1xf32, #tpu.memory_space<vmem>>, vector<16x1xf32>,
    } else {
    }
    %c0_i32_6 = arith.constant 0 : i32
    %13 = arith.cmpi eq, %9, %c0_i32_6 : i32
    %14 = arith.extui %13 : i1 to i32
    %c0_i32_7 = arith.constant 0 : i32
    %15 = arith.cmpi ne, %14, %c0_i32_7 : i32
    scf.if %15 {
      %c0_10 = arith.constant 0 : index
      %c0_11 = arith.constant 0 : index
      %19 = vector.load %arg6[%c0_10, %c0_11] : memref<16x1xi32, #tpu.memory_space<vmem>>, vector<16x1xi32>
      %c0_12 = arith.constant 0 : index
      %c0_13 = arith.constant 0 : index
      %20 = vector.load %arg7[%c0_12, %c0_13] : memref<1x16xi32, #tpu.memory_space<vmem>>, vector<1x16xi32>
      %21 = vector.broadcast %19 : vector<16x1xi32> to vector<16x16xi32>
      %22 = vector.broadcast %20 : vector<1x16xi32> to vector<16x16xi32>
      %23 = arith.cmpi eq, %21, %22 : vector<16x16xi32>
      %c0_14 = arith.constant 0 : index
      %c0_15 = arith.constant 0 : index
      %24 = vector.load %arg11[%c0_14, %c0_15] : memref<16x1xf32, #tpu.memory_space<vmem>>, vector<16x1xf32>
      %cst_16 = arith.constant dense<0xFF800000> : vector<16xf32>
      %25 = vector.multi_reduction <maximumf>, %5, %cst_16 [1] : vector<16x16xf32> to vector<16xf32>
      %26 = vector.shape_cast %25 : vector<16xf32> to vector<16x1xf32>
      %27 = arith.maximumf %24, %26 : vector<16x1xf32>
      %28 = arith.subf %24, %27 : vector<16x1xf32>
      %29 = math.exp %28 : vector<16x1xf32>
      %30 = vector.broadcast %27 : vector<16x1xf32> to vector<16x16xf32>
      %31 = arith.subf %5, %30 : vector<16x16xf32>
      %32 = math.exp %31 : vector<16x16xf32>
      %c0_17 = arith.constant 0 : index
      %c0_18 = arith.constant 0 : index
      %33 = vector.load %arg12[%c0_17, %c0_18] : memref<16x1xf32, #tpu.memory_space<vmem>>, vector<16x1xf32>
      %34 = arith.mulf %29, %33 : vector<16x1xf32>
      %cst_19 = arith.constant dense<0.000000e+00> : vector<16xf32>
      %35 = vector.multi_reduction <add>, %32, %cst_19 [1] : vector<16x16xf32> to vector<16xf32>
      %36 = vector.shape_cast %35 : vector<16xf32> to vector<16x1xf32>
      %37 = arith.addf %34, %36 : vector<16x1xf32>
      %c0_20 = arith.constant 0 : index
      %c0_21 = arith.constant 0 : index
      %38 = vector.load %arg12[%c0_20, %c0_21] : memref<16x1xf32, #tpu.memory_space<vmem>>, vector<16x1xf32>
      tpu.vector_store %arg12[%c0_20, %c0_21], %37 {strides = array<i32>} : memref<16x1xf32, #tpu.memory_space<vmem>>, vector<16x1xf32>,
      %c0_22 = arith.constant 0 : index
      %c0_23 = arith.constant 0 : index
      %39 = vector.load %arg11[%c0_22, %c0_23] : memref<16x1xf32, #tpu.memory_space<vmem>>, vector<16x1xf32>
      tpu.vector_store %arg11[%c0_22, %c0_23], %27 {strides = array<i32>} : memref<16x1xf32, #tpu.memory_space<vmem>>, vector<16x1xf32>,
      %c0_24 = arith.constant 0 : index
      %c0_25 = arith.constant 0 : index
      %40 = vector.load %arg13[%c0_24, %c0_25] : memref<16x1xf32, #tpu.memory_space<vmem>>, vector<16x1xf32>
      %cst_26 = arith.constant 0.000000e+00 : f32
      %41 = vector.broadcast %cst_26 : f32 to vector<16x16xf32>
      %42 = arith.select %23, %5, %41 : vector<16x16xi1>, vector<16x16xf32>
      %cst_27 = arith.constant dense<0.000000e+00> : vector<16xf32>
      %43 = vector.multi_reduction <add>, %42, %cst_27 [1] : vector<16x16xf32> to vector<16xf32>
      %44 = vector.shape_cast %43 : vector<16xf32> to vector<16x1xf32>
      %45 = arith.addf %40, %44 : vector<16x1xf32>
      %c0_28 = arith.constant 0 : index
      %c0_29 = arith.constant 0 : index
      %46 = vector.load %arg13[%c0_28, %c0_29] : memref<16x1xf32, #tpu.memory_space<vmem>>, vector<16x1xf32>
      tpu.vector_store %arg13[%c0_28, %c0_29], %45 {strides = array<i32>} : memref<16x1xf32, #tpu.memory_space<vmem>>, vector<16x1xf32>,
      %c0_30 = arith.constant 0 : index
      %c0_31 = arith.constant 0 : index
      %47 = vector.load %arg14[%c0_30, %c0_31] : memref<16x1xf32, #tpu.memory_space<vmem>>, vector<16x1xf32>
      %48 = arith.extui %23 : vector<16x16xi1> to vector<16x16xi32>
      %49 = arith.sitofp %48 : vector<16x16xi32> to vector<16x16xf32>
      %cst_32 = arith.constant dense<0.000000e+00> : vector<16xf32>
      %50 = vector.multi_reduction <add>, %49, %cst_32 [1] : vector<16x16xf32> to vector<16xf32>
      %51 = vector.shape_cast %50 : vector<16xf32> to vector<16x1xf32>
      %52 = arith.addf %47, %51 : vector<16x1xf32>
      %c0_33 = arith.constant 0 : index
      %c0_34 = arith.constant 0 : index
      %53 = vector.load %arg14[%c0_33, %c0_34] : memref<16x1xf32, #tpu.memory_space<vmem>>, vector<16x1xf32>
      tpu.vector_store %arg14[%c0_33, %c0_34], %52 {strides = array<i32>} : memref<16x1xf32, #tpu.memory_space<vmem>>, vector<16x1xf32>,
    } else {
    }
    %c0_i32_8 = arith.constant 0 : i32
    %16 = arith.cmpi eq, %arg1, %c0_i32_8 : i32
    %17 = arith.extui %16 : i1 to i32
    %c0_i32_9 = arith.constant 0 : i32
    %18 = arith.cmpi ne, %17, %c0_i32_9 : i32
    scf.if %18 {
      %c16_i32 = arith.constant 16 : i32
      %19 = arith.muli %arg0, %c16_i32 : i32
      %20 = tpu.iota {dimensions = array<i32: 0>} : vector<16x1xi32>
      %21 = vector.broadcast %19 : i32 to vector<16x1xi32>
      %22 = arith.addi %21, %20 : vector<16x1xi32>
      %c16_i32_10 = arith.constant 16 : i32
      %23 = vector.broadcast %c16_i32_10 : i32 to vector<16x1xi32>
      %24 = arith.cmpi slt, %22, %23 : vector<16x1xi32>
      %c0_11 = arith.constant 0 : index
      %c0_12 = arith.constant 0 : index
      %25 = vector.load %arg14[%c0_11, %c0_12] : memref<16x1xf32, #tpu.memory_space<vmem>>, vector<16x1xf32>
      %c0_13 = arith.constant 0 : index
      %c0_14 = arith.constant 0 : index
      %26 = vector.load %arg11[%c0_13, %c0_14] : memref<16x1xf32, #tpu.memory_space<vmem>>, vector<16x1xf32>
      %c0_15 = arith.constant 0 : index
      %c0_16 = arith.constant 0 : index
      %27 = vector.load %arg12[%c0_15, %c0_16] : memref<16x1xf32, #tpu.memory_space<vmem>>, vector<16x1xf32>
      %28 = math.log %27 : vector<16x1xf32>
      %29 = arith.addf %26, %28 : vector<16x1xf32>
      %cst_17 = arith.constant 0.000000e+00 : f32
      %30 = vector.broadcast %cst_17 : f32 to vector<16x1xf32>
      %31 = arith.cmpf ogt, %25, %30 : vector<16x1xf32>
      %32 = arith.andi %24, %31 : vector<16x1xi1>
      %c0_18 = arith.constant 0 : index
      %c0_19 = arith.constant 0 : index
      %33 = vector.load %arg13[%c0_18, %c0_19] : memref<16x1xf32, #tpu.memory_space<vmem>>, vector<16x1xf32>
      %34 = arith.divf %33, %25 : vector<16x1xf32>
      %35 = arith.subf %34, %29 : vector<16x1xf32>
      %cst_20 = arith.constant 0.000000e+00 : f32
      %36 = vector.broadcast %cst_20 : f32 to vector<16x1xf32>
      %37 = arith.select %32, %35, %36 : vector<16x1xi1>, vector<16x1xf32>
      %38 = vector.shape_cast %37 : vector<16x1xf32> to vector<1x16x1xf32>
      %cst_21 = arith.constant dense<0.000000e+00> : vector<1xf32>
      %39 = vector.multi_reduction <add>, %38, %cst_21 [1, 2] : vector<1x16x1xf32> to vector<1xf32>
      %40 = vector.shape_cast %39 : vector<1xf32> to vector<1x1x1xf32>
      %41 = vector.extract %40[0, 0, 0] : f32 from vector<1x1x1xf32>
      %cst_22 = arith.constant -0.892857134 : f32
      %42 = arith.mulf %41, %cst_22 : f32
      %43 = vector.broadcast %42 : f32 to vector<1x1x128xf32>
      %c0_23 = arith.constant 0 : index
      %c0_24 = arith.constant 0 : index
      %c0_25 = arith.constant 0 : index
      %44 = vector.load %arg9[%c0_23, %c0_24, %c0_25] : memref<1x1x128xf32, #tpu.memory_space<vmem>>, vector<1x1x128xf32>
      tpu.vector_store %arg9[%c0_23, %c0_24, %c0_25], %43 {strides = array<i32>} : memref<1x1x128xf32, #tpu.memory_space<vmem>>, vector<1x1x128xf32>,
    } else {
    }
    return
  }
  func.func @transform_0(%arg0: i32, %arg1: i32) -> i32 {
    %c0_i32 = arith.constant 0 : i32
    %c0_i32_0 = arith.constant 0 : i32
    return %c0_i32 : i32
  }
  func.func @transform_1(%arg0: i32, %arg1: i32) -> i32 {
    %c0_i32 = arith.constant 0 : i32
    %c0_i32_0 = arith.constant 0 : i32
    return %c0_i32 : i32
  }
  func.func @transform_2(%arg0: i32, %arg1: i32) -> (i32, i32) {
    %c0_i32 = arith.constant 0 : i32
    %c0_i32_0 = arith.constant 0 : i32
    return %arg0, %c0_i32 : i32, i32
  }
  func.func @transform_3(%arg0: i32, %arg1: i32) -> (i32, i32) {
    %c0_i32 = arith.constant 0 : i32
    %c0_i32_0 = arith.constant 0 : i32
    return %arg1, %c0_i32 : i32, i32
  }
  func.func @transform_4(%arg0: i32, %arg1: i32) -> (i32, i32) {
    %c0_i32 = arith.constant 0 : i32
    %c0_i32_0 = arith.constant 0 : i32
    return %arg0, %c0_i32 : i32, i32
  }
  func.func @transform_5(%arg0: i32, %arg1: i32) -> (i32, i32) {
    %c0_i32 = arith.constant 0 : i32
    %c0_i32_0 = arith.constant 0 : i32
    return %c0_i32, %arg1 : i32, i32
  }
  func.func @transform_6(%arg0: i32, %arg1: i32) -> (i32, i32) {
    %c0_i32 = arith.constant 0 : i32
    %c0_i32_0 = arith.constant 0 : i32
    return %arg0, %c0_i32 : i32, i32
  }
  func.func @transform_7(%arg0: i32, %arg1: i32) -> (i32, i32, i32) {
    %c0_i32 = arith.constant 0 : i32
    %c0_i32_0 = arith.constant 0 : i32
    %c0_i32_1 = arith.constant 0 : i32
    return %arg0, %c0_i32, %c0_i32_0 : i32, i32, i32
  }
}

</mosaic_0001>

<bundles_post_ra>
// kernel: tpu_custom_call.1
= control target key start
LH: loop header
LB: loop body
LE: loop exit
PB: predicated region body
PF: predicated region fallthrough
CT: control target
= control target key end

     0   :  { %14 = vsyncpa [#allocation10], 0  ;;  %vm44_vm0 = vcmask 7168   ;;  %v507_v1 = vmov -1e+30   ;;  %v508_v2 = vmov 0.0   ;;  %s682_s0 = inlined_call_operand.<no memory space> [shape: f32[1], index: 0, kind: input, shape index: {}]   ;;  %s683_s1 = inlined_call_operand.<no memory space> [shape: s32[1], index: 1, kind: input, shape index: {}]   ;;  %s684_s2 = inlined_call_operand.vmem [shape: f32[16,128], index: 2, kind: input, shape index: {}]   ;;  %s685_s3 = inlined_call_operand.vmem [shape: f32[16,128], index: 3, kind: input, shape index: {}]   ;;  %s686_s4 = inlined_call_operand.vmem [shape: s32[16,1], index: 4, kind: input, shape index: {}]   ;;  %s687_s5 = inlined_call_operand.vmem [shape: s32[1,16], index: 5, kind: input, shape index: {}]   ;;  %s688_s6 = inlined_call_operand.vmem [shape: s32[16,1], index: 6, kind: input, shape index: {}]   ;;  %s689_s7 = inlined_call_operand.hbm [shape: f32[1,1,128], index: 7, kind: output, shape index: {}]  }
   0x1   :  { %v34_v0 = vstv %s682_s0  ;;  %45 = vst.msk [vmem:[#allocation3] sm:$0xff] %vm44_vm0, %v507_v1  ;;  %46 = vst.msk [vmem:[#allocation3 + $0x8] sm:$0xff] %vm44_vm0, %v507_v1  ;;  %v56_v3 = vld [vmem:[%s685_s3 + $0x8] sm:$0xff]  ;;  %v55_v4 = vld [vmem:[%s685_s3] sm:$0xff]  ;;  %p425_p0 = scmp.eq.s32.totalorder %s683_s1, 0 }
   0x2   :  { %455 = vrcp.f32 %v34_v0  ;;  %47 = vst.msk [vmem:[#allocation4] sm:$0xff] %vm44_vm0, %v508_v2  ;;  %48 = vst.msk [vmem:[#allocation4 + $0x8] sm:$0xff] %vm44_vm0, %v508_v2  ;;  %437 = vmatprep.subr.mxu0 %v56_v3  ;;  %v38_v6 = vld [vmem:[%s684_s2 + $0x8] sm:$0xff]  ;;  %v37_v7 = vld [vmem:[%s684_s2] sm:$0xff] }
   0x3   :  { %49 = vst.msk [vmem:[#allocation5] sm:$0xff] %vm44_vm0, %v508_v2  ;;  %50 = vst.msk [vmem:[#allocation5 + $0x8] sm:$0xff] %vm44_vm0, %v508_v2  ;;  %438 = vmatpush3.xpose.msra.mxu0 %v56_v3 }
   0x4   :  { %51 = vst.msk [vmem:[#allocation6] sm:$0xff] %vm44_vm0, %v508_v2  ;;  %52 = vst.msk [vmem:[#allocation6 + $0x8] sm:$0xff] %vm44_vm0, %v508_v2  ;;  %439 = vmatprep.subr.mxu0 %v55_v4 }
   0x7   :  { %440 = vmatpush3.xpose.msra.mxu0 %v55_v4 }
   0xf   :  { %v456_v5 = vpop.eup %455 }
  0x10   :  { %444 = vpush %v456_v5 }
  0x41   :  { %s445_s10 = spop %444 }
  0x42   :  { %v39_v8 = vstv %s445_s10 }
  0x43   :  { %v41_v9 = vmul.f32 %v39_v8, %v38_v6  ;;  %v40_v10 = vmul.f32 %v39_v8, %v37_v7 }
  0x45   :  { %441 = vmatprep.mubr.f32.mxu0 %v40_v10 }
  0x46   :  { %442 = vmatmul.mubr.f32.vlgmr.msra.gmra.mxu0 %v41_v9 }
 0x104   :  { %137 = sbr.rel (%p425_p0) target bundleno = 827 (0x33b), region = 37 }
 0x106   :  { %v577_v11 = vpop.f32.mrf.mxu0 }
 0x108   :  { %v579_v12 = vpop.f32.mrf.mxu0 }
 0x109   :  { %v140_v13 = vld [vmem:[%s688_s6] sm:$0xff]  ;;  %v509_v14 = vmov 0   ;;  %v141_v15 = vld [vmem:[%s688_s6 + $0x8] sm:$0xff]  ;;  %v138_v16 = vlaneseq  ;;  %vm180_vm3 = vcmask 130048   ;;  %v510_v52 = vmov 0.0   ;;  %v211_v4 = vld [vmem:[#allocation4] sm:$0xff] }
 0x10a   :  { %457 = vset.pattern.permute.xlu0 %v509_v14  ;;  %458 = vset.pattern.permute.xlu1 %v509_v14  ;;  %v178_v26 = vld [vmem:[#allocation3] sm:$0xff]  ;;  %v179_v29 = vld [vmem:[#allocation3 + $0x8] sm:$0xff]  ;;  %v212_v8 = vld [vmem:[#allocation4 + $0x8] sm:$0xff] }
 0x10b   :  { %147 = vperm.xlu0 %457, %v140_v13   ;;  %v139_v17 = vand.u32 127, %v138_v16  ;;  %v161_v32 = vld [vmem:[%s686_s4] sm:$0xff]  ;;  %v162_v35 = vld [vmem:[%s686_s4 + $0x8] sm:$0xff]  ;;  %v242_v10 = vld [vmem:[#allocation6] sm:$0xff] }
 0x10c   :  { %v426_v38 = vld [vmem:[%s687_s5] ss:$0 sm:$0xff]  ;;  %v229_v0 = vld [vmem:[#allocation5 + $0x8] sm:$0xff] }
 0x10d   :  { %vm156_vm1 = vcmp.lt.s32.totalorder %v139_v17, 16  ;;  %v228_v61 = vld [vmem:[#allocation5] sm:$0xff] }
 0x10f   :  { %150 = vperm.xlu0 %457, %v141_v15  }
 0x186   :  { %v148_v18 = vpop.permute.xlu0 %147 }
 0x187   :  { %vm152_vm2 = vcmp.ne.s32.totalorder %v139_v17, %v148_v18  ;;  %v243_v18 = vld [vmem:[#allocation6 + $0x8] sm:$0xff] }
 0x188   :  { %vm590_vm4 = vmand %vm152_vm2, %vm156_vm1 }
 0x189   :  { %v159_v20 = vsel %vm590_vm4, %v579_v12, -1e+30 }
 0x18a   :  { %v151_v21 = vpop.permute.xlu0 %150  ;;  %v181_v22 = vsel %vm180_vm3, %v159_v20, -inf }
 0x18b   :  { %vm153_vm5 = vcmp.ne.s32.totalorder %v139_v17, %v151_v21  ;;  %182 = vmax.xlane.f32.xlu1 %v181_v22 }
 0x18c   :  { %vm598_vm6 = vmand %vm153_vm5, %vm156_vm1 }
 0x18d   :  { %v160_v24 = vsel %vm598_vm6, %v577_v11, -1e+30 }
 0x18e   :  { %v184_v25 = vsel %vm180_vm3, %v160_v24, -inf }
 0x18f   :  { %185 = vmax.xlane.f32.xlu1 %v184_v25 }
 0x214   :  { %v183_v27 = vpop.xlane.xlu1 %182 }
 0x215   :  { %v187_v28 = vmax.f32 %v178_v26, %v183_v27 }
 0x217   :  { %v189_v30 = vsub.f32 %v178_v26, %v187_v28  ;;  %226 = vst.msk [vmem:[#allocation3] sm:$0xff] %vm44_vm0, %v187_v28  ;;  %197 = vperm.xlu0 %457, %v187_v28  }
 0x218   :  { %v186_v31 = vpop.xlane.xlu1 %185 }
 0x219   :  { %v188_v33 = vmax.f32 %v179_v29, %v186_v31  ;;  %v191_v59 = vmul.f32 1.442695, %v189_v30 }
 0x21b   :  { %v190_v34 = vsub.f32 %v179_v29, %v188_v33  ;;  %227 = vst.msk [vmem:[#allocation3 + $0x8] sm:$0xff] %vm44_vm0, %v188_v33  ;;  %165 = vperm.xlu0 %457, %v161_v32   ;;  %202 = vperm.xlu1 %458, %v188_v33  }
 0x21d   :  { %v193_v60 = vmul.f32 1.442695, %v190_v34 }
 0x21f   :  { %168 = vperm.xlu0 %457, %v162_v35  }
 0x292   :  { %v198_v36 = vpop.permute.xlu0 %197 }
 0x293   :  { %v205_v37 = vsub.f32 %v159_v20, %v198_v36 }
 0x295   :  { %v207_v39 = vmul.f32 1.442695, %v205_v37 }
 0x296   :  { %v166_v40 = vpop.permute.xlu0 %165  ;;  %v203_v41 = vpop.permute.xlu1 %202 }
 0x297   :  { %459 = vpow2.f32 %v207_v39  ;;  %vm174_vm7 = vcmp.eq.s32.totalorder %v166_v40, %v426_v38  ;;  %v206_v42 = vsub.f32 %v160_v24, %v203_v41 }
 0x298   :  { %vm619_vm8 = vmand %vm174_vm7, %vm590_vm4 }
 0x299   :  { %v209_v44 = vmul.f32 1.442695, %v206_v42  ;;  %v230_v45 = vsel %vm619_vm8, %v159_v20, 0.0  ;;  %v427_v53 = vsel %vm619_vm8, 1.0, %v510_v52 }
 0x29a   :  { %v169_v46 = vpop.permute.xlu0 %168  ;;  %v232_v47 = vsel %vm180_vm3, %v230_v45, 0.0  ;;  %v248_v55 = vsel %vm180_vm3, %v427_v53, 0.0 }
 0x29b   :  { %461 = vpow2.f32 %v209_v44  ;;  %vm175_vm9 = vcmp.eq.s32.totalorder %v169_v46, %v426_v38  ;;  %233 = vadd.xlane.f32.xlu0 %v232_v47 }
 0x29c   :  { %vm177_vm10 = vmand %vm175_vm9, %vm598_vm6  ;;  %463 = vpow2.f32 %v191_v59 }
 0x29d   :  { %v231_v48 = vsel %vm177_vm10, %v160_v24, 0.0  ;;  %v428_v57 = vsel %vm177_vm10, 1.0, %v510_v52  ;;  %465 = vpow2.f32 %v193_v60 }
 0x29e   :  { %v235_v49 = vsel %vm180_vm3, %v231_v48, 0.0  ;;  %v251_v58 = vsel %vm180_vm3, %v428_v57, 0.0 }
 0x29f   :  { %236 = vadd.xlane.f32.xlu0 %v235_v49 }
 0x2a4   :  { %v460_v50 = vpop.eup %459 }
 0x2a5   :  { %v215_v51 = vsel %vm180_vm3, %v460_v50, 0.0 }
 0x2a6   :  { %216 = vadd.xlane.f32.xlu0 %v215_v51 }
 0x2a8   :  { %v462_v54 = vpop.eup %461 }
 0x2a9   :  { %v218_v56 = vsel %vm180_vm3, %v462_v54, 0.0  ;;  %v464_v3 = vpop.eup %463 }
 0x2aa   :  { %249 = vadd.xlane.f32.xlu0 %v248_v55  ;;  %219 = vadd.xlane.f32.xlu1 %v218_v56  ;;  %v213_v5 = vmul.f32 %v464_v3, %v211_v4  ;;  %v466_v6 = vpop.eup %465 }
 0x2ab   :  { %v214_v13 = vmul.f32 %v466_v6, %v212_v8 }
 0x2ae   :  { %252 = vadd.xlane.f32.xlu1 %v251_v58 }
 0x324   :  { %v234_v62 = vpop.xlane.xlu0 %233 }
 0x325   :  { %v238_v63 = vadd.f32 %v234_v62, %v228_v61 }
 0x327   :  { %240 = vst.msk [vmem:[#allocation5] sm:$0xff] %vm44_vm0, %v238_v63 }
 0x328   :  { %v237_v1 = vpop.xlane.xlu0 %236 }
 0x329   :  { %v239_v2 = vadd.f32 %v237_v1, %v229_v0 }
 0x32b   :  { %241 = vst.msk [vmem:[#allocation5 + $0x8] sm:$0xff] %vm44_vm0, %v239_v2 }
 0x32f   :  { %v217_v7 = vpop.xlane.xlu0 %216 }
 0x330   :  { %v221_v9 = vadd.f32 %v217_v7, %v213_v5 }
 0x332   :  { %224 = vst.msk [vmem:[#allocation4] sm:$0xff] %vm44_vm0, %v221_v9 }
 0x333   :  { %v250_v14 = vpop.xlane.xlu0 %249  ;;  %v220_v15 = vpop.xlane.xlu1 %219 }
 0x334   :  { %v254_v16 = vadd.f32 %v250_v14, %v242_v10  ;;  %v222_v17 = vadd.f32 %v220_v15, %v214_v13 }
 0x336   :  { %256 = vst.msk [vmem:[#allocation6] sm:$0xff] %vm44_vm0, %v254_v16  ;;  %225 = vst.msk [vmem:[#allocation4 + $0x8] sm:$0xff] %vm44_vm0, %v222_v17 }
 0x337   :  { %v253_v19 = vpop.xlane.xlu1 %252 }
 0x338   :  { %v255_v20 = vadd.f32 %v253_v19, %v243_v18 }
 0x33a   :  { %257 = vst.msk [vmem:[#allocation6 + $0x8] sm:$0xff] %vm44_vm0, %v255_v20 }
 0x33b PF:  { %p429_p1 = scmp.ne.s32.totalorder %s683_s1, 0 }
 0x33d   :  { %261 = sbr.rel (%p429_p1) target bundleno = 1268 (0x4f4), region = 41 }
 0x342   :  { %vm279_vm11 = vcmask 130048   ;;  %v511_v23 = vmov 0   ;;  %v262_v24 = vld [vmem:[%s686_s4] sm:$0xff]  ;;  %v278_v28 = vld [vmem:[#allocation3 + $0x8] sm:$0xff]  ;;  %v512_v46 = vmov 0.0   ;;  %v341_v62 = vld [vmem:[#allocation6] sm:$0xff] }
 0x343   :  { %v280_v21 = vsel %vm279_vm11, %v579_v12, -inf  ;;  %v283_v22 = vsel %vm279_vm11, %v577_v11, -inf  ;;  %467 = vset.pattern.permute.xlu1 %v511_v23  ;;  %468 = vset.pattern.permute.xlu0 %v511_v23  ;;  %v277_v25 = vld [vmem:[#allocation3] sm:$0xff]  ;;  %v263_v33 = vld [vmem:[%s686_s4 + $0x8] sm:$0xff]  ;;  %v310_v1 = vld [vmem:[#allocation4] sm:$0xff] }
 0x344   :  { %281 = vmax.xlane.f32.xlu0 %v280_v21  ;;  %v430_v34 = vld [vmem:[%s687_s5] ss:$0 sm:$0xff]  ;;  %v328_v59 = vld [vmem:[#allocation5 + $0x8] sm:$0xff]  ;;  %v311_v6 = vld [vmem:[#allocation4 + $0x8] sm:$0xff] }
 0x345   :  { %v327_v54 = vld [vmem:[#allocation5] sm:$0xff]  ;;  %v342_v13 = vld [vmem:[#allocation6 + $0x8] sm:$0xff] }
 0x348   :  { %284 = vmax.xlane.f32.xlu0 %v283_v22 }
 0x35e   :  { %266 = vperm.xlu0 %468, %v262_v24  }
 0x3cd   :  { %v282_v26 = vpop.xlane.xlu0 %281 }
 0x3ce   :  { %v286_v27 = vmax.f32 %v277_v25, %v282_v26 }
 0x3d0   :  { %v288_v29 = vsub.f32 %v277_v25, %v286_v27  ;;  %325 = vst.msk [vmem:[#allocation3] sm:$0xff] %vm44_vm0, %v286_v27  ;;  %296 = vperm.xlu1 %467, %v286_v27  }
 0x3d1   :  { %v285_v30 = vpop.xlane.xlu0 %284 }
 0x3d2   :  { %v287_v31 = vmax.f32 %v278_v28, %v285_v30  ;;  %v290_v57 = vmul.f32 1.442695, %v288_v29 }
 0x3d4   :  { %v289_v32 = vsub.f32 %v278_v28, %v287_v31  ;;  %326 = vst.msk [vmem:[#allocation3 + $0x8] sm:$0xff] %vm44_vm0, %v287_v31  ;;  %301 = vperm.xlu1 %467, %v287_v31  }
 0x3d6   :  { %v292_v58 = vmul.f32 1.442695, %v289_v32 }
 0x3d8   :  { %269 = vperm.xlu1 %467, %v263_v33  }
 0x3d9   :  { %v267_v35 = vpop.permute.xlu0 %266 }
 0x3da   :  { %vm275_vm12 = vcmp.eq.s32.totalorder %v267_v35, %v430_v34 }
 0x3db   :  { %v329_v36 = vsel %vm275_vm12, %v579_v12, 0.0  ;;  %v431_v47 = vsel %vm275_vm12, 1.0, %v512_v46 }
 0x3dc   :  { %v331_v37 = vsel %vm279_vm11, %v329_v36, 0.0  ;;  %v347_v49 = vsel %vm279_vm11, %v431_v47, 0.0 }
 0x3dd   :  { %332 = vadd.xlane.f32.xlu0 %v331_v37 }
 0x44b   :  { %v297_v38 = vpop.permute.xlu1 %296 }
 0x44c   :  { %v304_v39 = vsub.f32 %v579_v12, %v297_v38 }
 0x44e   :  { %v306_v40 = vmul.f32 1.442695, %v304_v39 }
 0x44f   :  { %v302_v41 = vpop.permute.xlu1 %301 }
 0x450   :  { %469 = vpow2.f32 %v306_v40  ;;  %v305_v42 = vsub.f32 %v577_v11, %v302_v41 }
 0x452   :  { %v308_v43 = vmul.f32 1.442695, %v305_v42 }
 0x453   :  { %v270_v44 = vpop.permute.xlu1 %269 }
 0x454   :  { %471 = vpow2.f32 %v308_v43  ;;  %vm276_vm13 = vcmp.eq.s32.totalorder %v270_v44, %v430_v34 }
 0x455   :  { %v330_v45 = vsel %vm276_vm13, %v577_v11, 0.0  ;;  %v432_v53 = vsel %vm276_vm13, 1.0, %v512_v46  ;;  %473 = vpow2.f32 %v290_v57 }
 0x456   :  { %v334_v48 = vsel %vm279_vm11, %v330_v45, 0.0  ;;  %v350_v11 = vsel %vm279_vm11, %v432_v53, 0.0  ;;  %475 = vpow2.f32 %v292_v58 }
 0x457   :  { %335 = vadd.xlane.f32.xlu1 %v334_v48 }
 0x45b   :  { %348 = vadd.xlane.f32.xlu1 %v347_v49 }
 0x45d   :  { %v470_v12 = vpop.eup %469 }
 0x45e   :  { %v314_v50 = vsel %vm279_vm11, %v470_v12, 0.0 }
 0x45f   :  { %315 = vadd.xlane.f32.xlu1 %v314_v50 }
 0x461   :  { %v472_v51 = vpop.eup %471 }
 0x462   :  { %v317_v52 = vsel %vm279_vm11, %v472_v51, 0.0  ;;  %v474_v63 = vpop.eup %473 }
 0x463   :  { %318 = vadd.xlane.f32.xlu1 %v317_v52  ;;  %v312_v3 = vmul.f32 %v474_v63, %v310_v1  ;;  %v476_v4 = vpop.eup %475 }
 0x464   :  { %v313_v8 = vmul.f32 %v476_v4, %v311_v6 }
 0x466   :  { %v333_v55 = vpop.xlane.xlu0 %332 }
 0x467   :  { %351 = vadd.xlane.f32.xlu1 %v350_v11  ;;  %v337_v56 = vadd.f32 %v333_v55, %v327_v54 }
 0x469   :  { %339 = vst.msk [vmem:[#allocation5] sm:$0xff] %vm44_vm0, %v337_v56 }
 0x4e0   :  { %v336_v60 = vpop.xlane.xlu1 %335 }
 0x4e1   :  { %v338_v61 = vadd.f32 %v336_v60, %v328_v59 }
 0x4e3   :  { %340 = vst.msk [vmem:[#allocation5 + $0x8] sm:$0xff] %vm44_vm0, %v338_v61 }
 0x4e4   :  { %v349_v0 = vpop.xlane.xlu1 %348 }
 0x4e5   :  { %v353_v2 = vadd.f32 %v349_v0, %v341_v62 }
 0x4e7   :  { %355 = vst.msk [vmem:[#allocation6] sm:$0xff] %vm44_vm0, %v353_v2 }
 0x4e8   :  { %v316_v5 = vpop.xlane.xlu1 %315 }
 0x4e9   :  { %v320_v7 = vadd.f32 %v316_v5, %v312_v3 }
 0x4eb   :  { %323 = vst.msk [vmem:[#allocation4] sm:$0xff] %vm44_vm0, %v320_v7 }
 0x4ec   :  { %v319_v9 = vpop.xlane.xlu1 %318 }
 0x4ed   :  { %v321_v10 = vadd.f32 %v319_v9, %v313_v8 }
 0x4ef   :  { %324 = vst.msk [vmem:[#allocation4 + $0x8] sm:$0xff] %vm44_vm0, %v321_v10 }
 0x4f0   :  { %v352_v14 = vpop.xlane.xlu1 %351 }
 0x4f1   :  { %v354_v15 = vadd.f32 %v352_v14, %v342_v13 }
 0x4f3   :  { %356 = vst.msk [vmem:[#allocation6 + $0x8] sm:$0xff] %vm44_vm0, %v354_v15 }
 0x4f4 PF:  { %v369_v16 = vld [vmem:[#allocation6] sm:$0xff]  ;;  %v385_v20 = vld [vmem:[#allocation5] sm:$0xff]  ;;  %v386_v24 = vld [vmem:[#allocation5 + $0x8] sm:$0xff]  ;;  %s513_s4 = smov [#allocation9]  }
 0x4f5   :  { %v373_v18 = vld [vmem:[#allocation4] sm:$0xff]  ;;  %477 = vrcp.f32 %v369_v16  ;;  %v371_v23 = vld [vmem:[#allocation3] sm:$0xff]  ;;  %v372_v26 = vld [vmem:[#allocation3 + $0x8] sm:$0xff]  ;;  %vm381_vm14 = vcmp.gt.f32.partialorder %v369_v16, 0.0  ;;  %s417_s5 = sshll.u32 %s513_s4, 4  ;;  %s418_s5 = int_to_ptr.vmem [resolvable:$true] %s417_s5 }
 0x4f6   :  { %v374_v19 = vld [vmem:[#allocation4 + $0x8] sm:$0xff]  ;;  %479 = vlog2.f32 %v373_v18  ;;  %s485_s28 = scalar_lea.vmem %s418_s5, 16  ;;  %s489_s29 = scalar_lea.vmem %s418_s5, 32 }
 0x4f7   :  { %481 = vlog2.f32 %v374_v19  ;;  %p486_p2 = scmp.ne.s32.totalorder %s418_s5, %s485_s28  ;;  %p490_p3 = scmp.lt.s32.totalorder %s418_s5, %s418_s5 }
 0x4f8   :  { %p491_p4 = scmp.lt.s32.totalorder %s489_s29, %s485_s28 }
 0x4fa   :  { %v370_v17 = vld [vmem:[#allocation6 + $0x8] sm:$0xff]  ;;  %p492_p5 = por %p491_p4, %p490_p3 }
 0x4fb   :  { %483 = vrcp.f32 %v370_v17  ;;  %vm382_vm15 = vcmp.gt.f32.partialorder %v370_v17, 0.0 }
 0x4fc   :  { %p493_p6 = pnand %p492_p5, %p486_p2 }
 0x502   :  { %v478_v21 = vpop.eup %477 }
 0x503   :  { %v480_v22 = vpop.eup %479  ;;  %v388_v28 = vmul.f32 %v478_v21, %v385_v20 }
 0x504   :  { %v482_v25 = vpop.eup %481  ;;  %v376_v27 = vmul.f32 0.6931472, %v480_v22 }
 0x505   :  { %v378_v30 = vmul.f32 0.6931472, %v482_v25 }
 0x506   :  { %v379_v31 = vadd.f32 %v376_v27, %v371_v23 }
 0x507   :  { %v380_v33 = vadd.f32 %v378_v30, %v372_v26 }
 0x508   :  { %v484_v29 = vpop.eup %483  ;;  %v391_v34 = vsub.f32 %v388_v28, %v379_v31 }
 0x509   :  { %v390_v32 = vmul.f32 %v484_v29, %v386_v24 }
 0x50a   :  { %v393_v36 = vsel %vm381_vm14, %v391_v34, 0.0 }
 0x50b   :  { %v392_v35 = vsub.f32 %v390_v32, %v380_v33  ;;  %v396_v38 = vsel %vm44_vm0, %v393_v36, 0.0 }
 0x50d   :  { %v394_v37 = vsel %vm382_vm15, %v392_v35, 0.0 }
 0x50e   :  { %v397_v39 = vsel %vm44_vm0, %v394_v37, 0.0 }
 0x50f   :  { %v398_v40 = vadd.f32 %v397_v39, %v396_v38 }
 0x511   :  { %399 = vadd.xlane.f32.xlu0 %v398_v40 }
 0x59a   :  { %v400_v41 = vpop.xlane.xlu0 %399 }
 0x59b   :  { %v401_v42 = vrot.slane %v400_v41, 4 }
 0x59d   :  { %v402_v43 = vadd.f32 %v401_v42, %v400_v41 }
 0x59f   :  { %v403_v44 = vrot.slane %v402_v43, 2 }
 0x5a1   :  { %v404_v45 = vadd.f32 %v403_v44, %v402_v43 }
 0x5a3   :  { %v405_v46 = vrot.slane %v404_v45, 1 }
 0x5a5   :  { %v406_v47 = vadd.f32 %v405_v46, %v404_v45 }
 0x5a7   :  { %446 = vpush %v406_v47 }
 0x5d8   :  { %s447_s26 = spop %446 }
 0x5d9   :  { %s408_s27 = smul.f32 -0.89285713, %s447_s26 }
 0x5db   :  { %v409_v48 = vstv %s408_s27 }
 0x5dc   :  { %410 = vst [vmem:[#allocation9] sm:$0x1] %v409_v48 }
 0x5dd   :  { %496 = shalt.err (!%p493_p6)
}
 0x5de   :  { %420 = dma.vmem_to_hbm [thread:$0]  %s418_s5, 16, %s689_s7, [#allocation10]  }
 0x5df   :  { %505 = dma.done.wait [#allocation10], 16  }
 0x5e0   :  { %506 = vsyncadd [#allocation10], 4294967280 }
 0x5e1   :  { %424 = vsyncpa [#allocation10], 1 }

</bundles_post_ra>
